<compile_context>
chip_gen: v7x
topology: tpu7x:2x2x1
jax: 0.10.0
libtpu: 0.0.40
codegen_flags: <defaults>
</compile_context>

<pallas_src>
import jax
import jax.numpy as jnp
from jax.experimental import pallas as pl
from jax.experimental.pallas import tpu as pltpu

_EPS = 1e-12  # F.normalize default


# ---------------------------------------------------------------------------
# Pallas kernel: scores = <query, u_j> over H, then L2-normalize over N.
# ---------------------------------------------------------------------------
def attention_kernel(q_ref, u_ref, o_ref):
    u = u_ref[...]                                     # [Bb, N, H] f32
    q = q_ref[...].reshape(1, 1, q_ref.shape[-1])      # [1, 1, H]

    # scores[b, n] = sum_h query[h] * u[b, n, h]   (VPU mul + XLU lane reduce)
    scores = jnp.sum(u * q, axis=-1)                   # [Bb, N]

    # F.normalize(scores, dim=-1): scores / max(||scores||_2, eps).
    # rsqrt(max(ssq, eps^2)) == 1 / max(sqrt(ssq), eps)  (sqrt monotone),
    # so eps semantics match while the op lands on the (otherwise idle) EUP.
    ssq = jnp.sum(scores * scores, axis=-1, keepdims=True)        # [Bb, 1]
    inv = jax.lax.rsqrt(jnp.maximum(ssq, _EPS * _EPS))            # [Bb, 1]

    o_ref[...] = (scores * inv).astype(o_ref.dtype)    # lane-dense slab store


# ---------------------------------------------------------------------------
# Wrapper
# ---------------------------------------------------------------------------
def attention_forward(query, u_vecs, *, block_b=128):
    """query: [H] f32, u_vecs: [B, N, H] (or [N, H]) f32 -> [B, N] (or [N])."""
    squeeze = u_vecs.ndim == 2
    if squeeze:
        u_vecs = u_vecs[None]
    B, N, H = u_vecs.shape
    assert query.shape == (H,)

    bb = min(block_b, B)
    grid = (pl.cdiv(B, bb),)

    out = pl.pallas_call(
        attention_kernel,
        out_shape=jax.ShapeDtypeStruct((B, N), jnp.float32),
        grid_spec=pltpu.PrefetchScalarGridSpec(
            num_scalar_prefetch=0,
            grid=grid,
            in_specs=[
                # query: tiny, constant block index -> stays resident in VMEM
                pl.BlockSpec((1, H), lambda i: (0, 0)),
                # u_vecs: one slab of bb independent rows per grid step
                pl.BlockSpec((bb, N, H), lambda i: (i, 0, 0)),
            ],
            out_specs=pl.BlockSpec((bb, N), lambda i: (i, 0)),
        ),
        compiler_params=pltpu.CompilerParams(
            # rows are independent -> megacore-shardable on v7x
            dimension_semantics=("parallel",)),
    )(query.reshape(1, H).astype(jnp.float32), u_vecs.astype(jnp.float32))

    return out[0] if squeeze else out


# ---------------------------------------------------------------------------
# Demo + self-check
# ---------------------------------------------------------------------------
if __name__ == "__main__":
    B, N, H = 2, 8, 32  # batch=2, batch_length=8, hidden_dim_attn=32

    key = jax.random.PRNGKey(0)
    kq, ku = jax.random.split(key)
    query = jax.random.uniform(kq, (H,), jnp.float32)          # torch .uniform_()
    u_vecs = jax.random.normal(ku, (B, N, H), jnp.float32)

    out = attention_forward(query, u_vecs)
    out = jax.block_until_ready(out)

    # Pure-JAX reference of the torch forward (matmul + F.normalize).
    ref_scores = jnp.einsum("h,bnh->bn", query, u_vecs)
    ref = ref_scores / jnp.maximum(
        jnp.linalg.norm(ref_scores, axis=-1, keepdims=True), _EPS)

    assert out.shape == (B, N), out.shape
    assert out.dtype == jnp.float32
    assert jnp.allclose(out, ref, atol=1e-5, rtol=1e-5)
    print("KERNEL_OK")
</pallas_src>

<mosaic_0001>
module attributes {stable_mosaic.version = 11 : i64} {
  func.func @attention_kernel(%arg0: i32, %arg1: memref<1x32xf32, #tpu.memory_space<vmem>>, %arg2: memref<2x8x32xf32, #tpu.memory_space<vmem>>, %arg3: memref<2x8xf32, #tpu.memory_space<vmem>>) attributes {dimension_semantics = [#tpu.dimension_semantics<parallel>], iteration_bounds = array<i64: 1>, scalar_prefetch = 0 : i64, scratch_operands = 0 : i64, tpu.core_type = #tpu.core_type<tc>, window_params = [{pipeline_mode = #tpu.pipeline_mode<synchronous>, transform_indices = @transform_0, window_bounds = array<i64: 1, 32>}, {transform_indices = @transform_1, window_bounds = array<i64: 2, 8, 32>}, {transform_indices = @transform_2, window_bounds = array<i64: 2, 8>}]} {
    %c0 = arith.constant 0 : index
    %c0_0 = arith.constant 0 : index
    %c0_1 = arith.constant 0 : index
    %0 = vector.load %arg2[%c0, %c0_0, %c0_1] : memref<2x8x32xf32, #tpu.memory_space<vmem>>, vector<2x8x32xf32>
    %c0_2 = arith.constant 0 : index
    %c0_3 = arith.constant 0 : index
    %1 = vector.load %arg1[%c0_2, %c0_3] : memref<1x32xf32, #tpu.memory_space<vmem>>, vector<1x32xf32>
    %2 = vector.shape_cast %1 : vector<1x32xf32> to vector<1x1x32xf32>
    %3 = vector.broadcast %2 : vector<1x1x32xf32> to vector<2x8x32xf32>
    %4 = arith.mulf %0, %3 : vector<2x8x32xf32>
    %cst = arith.constant dense<0.000000e+00> : vector<2x8xf32>
    %5 = vector.multi_reduction <add>, %4, %cst [2] : vector<2x8x32xf32> to vector<2x8xf32>
    %6 = arith.mulf %5, %5 : vector<2x8xf32>
    %cst_4 = arith.constant dense<0.000000e+00> : vector<2xf32>
    %7 = vector.multi_reduction <add>, %6, %cst_4 [1] : vector<2x8xf32> to vector<2xf32>
    %8 = vector.shape_cast %7 : vector<2xf32> to vector<2x1xf32>
    %cst_5 = arith.constant 1.000000e-24 : f32
    %9 = vector.broadcast %cst_5 : f32 to vector<2x1xf32>
    %10 = arith.maximumf %8, %9 : vector<2x1xf32>
    %11 = math.rsqrt %10 : vector<2x1xf32>
    %12 = vector.broadcast %11 : vector<2x1xf32> to vector<2x8xf32>
    %13 = arith.mulf %5, %12 : vector<2x8xf32>
    %c0_6 = arith.constant 0 : index
    %c0_7 = arith.constant 0 : index
    %14 = vector.load %arg3[%c0_6, %c0_7] : memref<2x8xf32, #tpu.memory_space<vmem>>, vector<2x8xf32>
    tpu.vector_store %arg3[%c0_6, %c0_7], %13 {strides = array<i32>} : memref<2x8xf32, #tpu.memory_space<vmem>>, vector<2x8xf32>,
    return
  }
  func.func @transform_0(%arg0: i32) -> (i32, i32) {
    %c0_i32 = arith.constant 0 : i32
    %c0_i32_0 = arith.constant 0 : i32
    %c0_i32_1 = arith.constant 0 : i32
    return %c0_i32, %c0_i32_0 : i32, i32
  }
  func.func @transform_1(%arg0: i32) -> (i32, i32, i32) {
    %c0_i32 = arith.constant 0 : i32
    %c0_i32_0 = arith.constant 0 : i32
    %c0_i32_1 = arith.constant 0 : i32
    return %arg0, %c0_i32, %c0_i32_0 : i32, i32, i32
  }
  func.func @transform_2(%arg0: i32) -> (i32, i32) {
    %c0_i32 = arith.constant 0 : i32
    %c0_i32_0 = arith.constant 0 : i32
    return %arg0, %c0_i32 : i32, i32
  }
}

</mosaic_0001>

<bundles_post_ra>
// kernel: tpu_custom_call.1
= control target key start
LH: loop header
LB: loop body
LE: loop exit
PB: predicated region body
PF: predicated region fallthrough
CT: control target
= control target key end

     0   :  { %7 = vsyncpa [#allocation3], 0  ;;  %s278_s0 = inlined_call_operand.hbm [shape: f32[1,32], index: 0, kind: input, shape index: {}]   ;;  %s279_s1 = inlined_call_operand.hbm [shape: f32[2,8,32], index: 1, kind: input, shape index: {}]   ;;  %s280_s2 = inlined_call_operand.hbm [shape: f32[2,8], index: 2, kind: output, shape index: {}]  }
   0x1   :  { %8 = vsyncpa [#allocation6], 0 }
   0x2   :  { %9 = vsyncpa [#allocation4], 0  ;;  %s210_s9 = smov [#allocation2]   ;;  %s211_s11 = smov [#allocation5]  }
   0x3   :  { %s16_s10 = sshll.u32 %s210_s9, 4  ;;  %s25_s12 = sshll.u32 %s211_s11, 4  ;;  %s17_s10 = int_to_ptr.vmem [resolvable:$true] %s16_s10  ;;  %s231_s12 = int_to_ptr.vmem [resolvable:$true] %s25_s12 }
   0x4   :  { %s138_s15 = scalar_lea.hbm %s278_s0, 16 }
   0x5   :  { %p139_p0 = scmp.ne.s32.totalorder %s278_s0, %s138_s15  ;;  %p142_p1 = scmp.lt.u32.totalorder %s138_s15, %s278_s0 }
   0x7   :  { %p144_p2 = pnand %p142_p1, %p139_p0 }
   0x9   :  { %147 = shalt.err (!%p144_p2)
}
   0xa   :  { %s148_s20 = scalar_lea.vmem %s17_s10, 16  ;;  %s152_s21 = scalar_lea.vmem %s17_s10, 32 }
   0xb   :  { %p149_p3 = scmp.ne.s32.totalorder %s17_s10, %s148_s20  ;;  %p153_p4 = scmp.lt.s32.totalorder %s17_s10, %s17_s10 }
   0xc   :  { %p154_p5 = scmp.lt.s32.totalorder %s152_s21, %s148_s20 }
   0xe   :  { %p155_p6 = por %p154_p5, %p153_p4 }
  0x10   :  { %p156_p7 = pnand %p155_p6, %p149_p3 }
  0x12   :  { %159 = shalt.err (!%p156_p7)
}
  0x13   :  { %19 = dma.hbm_to_vmem [thread:$0]  %s278_s0, 16, %s17_s10, [#allocation3]  }
  0x14   :  { %s160_s26 = scalar_lea.hbm %s279_s1, 256 }
  0x15   :  { %p161_p8 = scmp.ne.s32.totalorder %s279_s1, %s160_s26  ;;  %p164_p9 = scmp.lt.u32.totalorder %s160_s26, %s279_s1 }
  0x17   :  { %p166_p10 = pnand %p164_p9, %p161_p8 }
  0x19   :  { %169 = shalt.err (!%p166_p10)
}
  0x1a   :  { %s170_s3 = scalar_lea.vmem %s231_s12, 256  ;;  %p175_p12 = scmp.lt.s32.totalorder %s231_s12, %s231_s12 }
  0x1b   :  { %p171_p11 = scmp.ne.s32.totalorder %s231_s12, %s170_s3  ;;  %p176_p13 = scmp.lt.s32.totalorder %s170_s3, %s170_s3 }
  0x1d   :  { %p177_p0 = por %p176_p13, %p175_p12 }
  0x1f   :  { %p178_p1 = pnand %p177_p0, %p171_p11 }
  0x21   :  { %181 = shalt.err (!%p178_p1)
}
  0x22   :  { %s212_s0 = smov 128   ;;  %s213_s4 = smov 8  }
  0x23   :  { %31 = dma.hbm_to_vmem [thread:$0]  %s279_s1, 256, %s231_s12, [#allocation6], %s212_s0, %s212_s0, %s213_s4  }
  0x24   :  { %204 = dma.done.wait [#allocation3], 16  }
  0x25   :  { %205 = vsyncadd [#allocation3], 4294967280 }
  0x26   :  { %206 = dma.done.wait [#allocation6], 256  }
  0x27   :  { %207 = vsyncadd [#allocation6], 4294967040  ;;  %v38_v0 = vld [vmem:[#allocation5] sm:$0xff]  ;;  %v127_v1 = vld [vmem:[#allocation2] ss:$0 sm:$0xff]  ;;  %vm49_vm0 = vcmask 261120   ;;  %v60_v7 = vlaneseq }
  0x28   :  { %v39_v2 = vld [vmem:[#allocation5 + $0x8] sm:$0xff]  ;;  %v47_v3 = vmul.f32 %v127_v1, %v38_v0  ;;  %vm70_vm1 = vcmask 1041409   ;;  %vm73_vm2 = vcmask 58368   ;;  %v214_v19 = vmov 0   ;;  %s215_s1 = smov [#allocation7]  }
  0x29   :  { %v48_v4 = vmul.f32 %v127_v1, %v39_v2  ;;  %v61_v8 = vand.u32 127, %v60_v7  ;;  %v63_v9 = vshrl.u32 %v60_v7, 7  ;;  %135 = vset.pattern.permute.xlu0 %v214_v19  ;;  %134 = vset.pattern.permute.xlu1 %v214_v19  ;;  %s117_s7 = sshll.u32 %s215_s1, 4  ;;  %s118_s7 = int_to_ptr.vmem [resolvable:$true] %s117_s7 }
  0x2a   :  { %v50_v5 = vsel %vm49_vm0, %v47_v3, 0.0  ;;  %s182_s8 = scalar_lea.vmem %s118_s7, 32  ;;  %p187_p3 = scmp.lt.s32.totalorder %s118_s7, %s118_s7 }
  0x2b   :  { %51 = vadd.xlane.f32.xlu0 %v50_v5  ;;  %v53_v6 = vsel %vm49_vm0, %v48_v4, 0.0  ;;  %v64_v11 = vsub.s32 %v61_v8, %v63_v9  ;;  %v86_v22 = vsub.s32 1, %v63_v9  ;;  %v82_v23 = vsub.s32 0, %v63_v9  ;;  %p183_p2 = scmp.ne.s32.totalorder %s118_s7, %s182_s8  ;;  %p188_p4 = scmp.lt.s32.totalorder %s182_s8, %s182_s8 }
  0x2d   :  { %p189_p5 = por %p188_p4, %p187_p3 }
  0x2f   :  { %54 = vadd.xlane.f32.xlu0 %v53_v6  ;;  %p190_p6 = pnand %p189_p5, %p183_p2 }
  0xb8   :  { %v52_v10 = vpop.xlane.xlu0 %51 }
  0xb9   :  { %v56_v12 = vmul.f32 %v52_v10, %v52_v10 }
  0xbb   :  { %v65_v15 = vrot.slane %v56_v12, %v64_v11 }
  0xbc   :  { %v55_v13 = vpop.xlane.xlu0 %54 }
  0xbd   :  { %v57_v14 = vmul.f32 %v55_v13, %v55_v13 }
  0xbf   :  { %v69_v16 = vrot.slane %v57_v14, %v64_v11 }
  0xc1   :  { %v71_v17 = vsel %vm70_vm1, %v69_v16, %v65_v15 }
  0xc2   :  { %v74_v18 = vsel %vm73_vm2, %v71_v17, 0.0 }
  0xc3   :  { %75 = vadd.xlane.f32.xlu1 %v74_v18 }
 0x150   :  { %v76_v20 = vpop.xlane.xlu1 %75 }
 0x151   :  { %v77_v21 = vmax.f32 %v76_v20, 1e-24 }
 0x153   :  { %136 = vrsqrt.f32 %v77_v21 }
 0x15d   :  { %v137_v24 = vpop.eup %136 }
 0x15e   :  { %v87_v25 = vrot.slane %v137_v24, %v86_v22  ;;  %v83_v26 = vrot.slane %v137_v24, %v82_v23 }
 0x160   :  { %v91_v27 = vmul.f32 %v87_v25, %v55_v13  ;;  %v90_v28 = vmul.f32 %v83_v26, %v52_v10 }
 0x162   :  { %98 = vperm.xlu0 %135, %v91_v27   ;;  %95 = vperm.xlu1 %134, %v90_v28  }
 0x1e1   :  { %v99_v29 = vpop.permute.xlu0 %98  ;;  %v96_v30 = vpop.permute.xlu1 %95 }
 0x1e2   :  { %v107_v31 = vrot.slane %v99_v29, %v64_v11  ;;  %v103_v32 = vrot.slane %v96_v30, %v64_v11 }
 0x1e4   :  { %v108_v33 = vsel %vm70_vm1, %v107_v31, %v103_v32 }
 0x1e5   :  { %110 = vst.msk [vmem:[#allocation7] sm:$0x3] %vm73_vm2, %v108_v33 }
 0x1e6   :  { %193 = shalt.err (!%p190_p6)
}
 0x1e7   :  { %s194_s11 = scalar_lea.hbm %s280_s2, 32 }
 0x1e8   :  { %p195_p7 = scmp.ne.s32.totalorder %s280_s2, %s194_s11  ;;  %p198_p8 = scmp.lt.u32.totalorder %s194_s11, %s280_s2 }
 0x1ea   :  { %p200_p9 = pnand %p198_p8, %p195_p7 }
 0x1ec   :  { %203 = shalt.err (!%p200_p9)
}
 0x1ed   :  { %120 = dma.vmem_to_hbm [thread:$0]  %s118_s7, 32, %s280_s2, [#allocation4]  }
 0x1ee   :  { %208 = dma.done.wait [#allocation4], 32  }
 0x1ef   :  { %209 = vsyncadd [#allocation4], 4294967264 }
 0x1f0   :  { %124 = vsyncpa [#allocation3], 1 }
 0x1f1   :  { %125 = vsyncpa [#allocation6], 1 }
 0x1f2   :  { %126 = vsyncpa [#allocation4], 1 }

</bundles_post_ra>
